<compile_context>
chip_gen: v7x
topology: tpu7x:2x2x1
jax: 0.10.0
libtpu: 0.0.40
codegen_flags: <defaults>
</compile_context>

<pallas_src>
import jax
import jax.numpy as jnp
from jax.experimental import pallas as pl
from jax.experimental.pallas import tpu as pltpu

IN_F = 5      # input features
HID = 10      # hidden width
OUT_F = 3     # logits
LANE = 128    # lane-dense padded width for hidden / output features


def _round_up(x, m):
    return ((x + m - 1) // m) * m


def mlp_kernel(x_ref, w1_ref, wrest_ref, b_ref, out_ref):
    """Fused 4-layer MLP on one (TB, 5) batch tile.

    x_ref     : (TB, 5)        streamed input tile (f32 or bf16)
    w1_ref    : (5, 128)       layer-1 weight, zero-padded on N (resident)
    wrest_ref : (3, 128, 128)  layers 2..4 weights, zero-padded K/N (resident)
    b_ref     : (4, 1, 128)    biases, zero-padded, f32 (resident)
    out_ref   : (TB, 128)      lane-dense padded logits (cols >= 3 are zero)
    """
    # Layer 1: (TB,5) @ (5,128) with f32 accumulation on the MXU.
    h = jnp.dot(x_ref[...], w1_ref[...], preferred_element_type=jnp.float32)
    h = jnp.maximum(h + b_ref[0], 0.0)

    # Layers 2 and 3 (+ ReLU). Zero-padded rows/cols make the padded matmul
    # exactly equal to the un-padded math; intermediates stay f32.
    for l in range(2):
        h = jnp.dot(h, wrest_ref[l], preferred_element_type=jnp.float32)
        h = jnp.maximum(h + b_ref[l + 1], 0.0)

    # Layer 4 (no ReLU). Full 128-lane store -> unmasked vst.
    h = jnp.dot(h, wrest_ref[2], preferred_element_type=jnp.float32)
    out_ref[...] = (h + b_ref[3]).astype(out_ref.dtype)


def init_params(key):
    """PyTorch-style Linear init: U(-1/sqrt(fan_in), 1/sqrt(fan_in))."""
    dims = [(IN_F, HID), (HID, HID), (HID, HID), (HID, OUT_F)]
    params = []
    keys = jax.random.split(key, 2 * len(dims))
    for i, (fan_in, fan_out) in enumerate(dims):
        bound = 1.0 / (fan_in ** 0.5)
        w = jax.random.uniform(keys[2 * i], (fan_in, fan_out),
                               minval=-bound, maxval=bound, dtype=jnp.float32)
        b = jax.random.uniform(keys[2 * i + 1], (1, fan_out),
                               minval=-bound, maxval=bound, dtype=jnp.float32)
        params.append((w, b))
    return params


def pack_params(params, param_dtype=jnp.float32):
    """Zero-pad the 4 Linear layers to 128 lanes and pack into 3 operands."""
    (w1, b1), (w2, b2), (w3, b3), (w4, b4) = params

    def pad_w(w, rows, cols):
        return jnp.zeros((rows, cols), jnp.float32).at[: w.shape[0], : w.shape[1]].set(w)

    def pad_b(b):
        return jnp.zeros((1, LANE), jnp.float32).at[:, : b.shape[-1]].set(b.reshape(1, -1))

    w1p = pad_w(w1, IN_F, LANE).astype(param_dtype)                      # (5, 128)
    wrest = jnp.stack([pad_w(w2, LANE, LANE),
                       pad_w(w3, LANE, LANE),
                       pad_w(w4, LANE, LANE)]).astype(param_dtype)        # (3, 128, 128)
    biases = jnp.stack([pad_b(b1), pad_b(b2), pad_b(b3), pad_b(b4)])      # (4, 1, 128) f32
    return w1p, wrest, biases


def neural_network_forward(x, params, *, tile_b=1024, param_dtype=jnp.float32):
    """x: (B, 5). Returns logits (B, 3) in f32."""
    B = x.shape[0]
    w1p, wrest, biases = pack_params(params, param_dtype)
    x_in = x.astype(param_dtype)

    # Batch tile: multiple of 8 sublanes, no larger than the (padded) batch.
    tb = min(tile_b, _round_up(B, 8))
    tb = max(8, (tb // 8) * 8)
    b_pad = _round_up(B, tb)
    if b_pad != B:
        x_in = jnp.pad(x_in, ((0, b_pad - B), (0, 0)))

    grid = (pl.cdiv(b_pad, tb),)

    flops = 2 * b_pad * (IN_F * HID + HID * HID + HID * HID + HID * OUT_F)
    bytes_accessed = (
        b_pad * IN_F * x_in.dtype.itemsize          # streamed input
        + b_pad * LANE * 4                           # lane-dense padded output
        + int(w1p.size) * w1p.dtype.itemsize
        + int(wrest.size) * wrest.dtype.itemsize
        + int(biases.size) * 4
    )

    out_padded = pl.pallas_call(
        mlp_kernel,
        out_shape=jax.ShapeDtypeStruct((b_pad, LANE), jnp.float32),
        grid=grid,
        in_specs=[
            pl.BlockSpec((tb, IN_F), lambda i: (i, 0)),          # streamed batch tile
            pl.BlockSpec((IN_F, LANE), lambda i: (0, 0)),        # resident weights
            pl.BlockSpec((3, LANE, LANE), lambda i: (0, 0, 0)),  # resident weights
            pl.BlockSpec((4, 1, LANE), lambda i: (0, 0, 0)),     # resident biases
        ],
        out_specs=pl.BlockSpec((tb, LANE), lambda i: (i, 0)),
        compiler_params=pltpu.CompilerParams(
            dimension_semantics=("parallel",),   # shards batch tiles across TCs (v7x)
        ),
        cost_estimate=pl.CostEstimate(
            flops=flops, transcendentals=0, bytes_accessed=int(bytes_accessed)
        ),
    )(x_in, w1p, wrest, biases)

    # Wrapper-side layout plumbing: drop batch padding and lane padding.
    return out_padded[:B, :OUT_F]


def reference_forward(x, params, param_dtype=jnp.float32):
    """Pure-JAX reference, with optional input/weight cast to mirror the kernel."""
    h = x.astype(param_dtype).astype(jnp.float32)
    for i, (w, b) in enumerate(params):
        w = w.astype(param_dtype).astype(jnp.float32)
        h = h @ w + b
        if i < len(params) - 1:
            h = jnp.maximum(h, 0.0)
    return h


if __name__ == "__main__":
    key = jax.random.PRNGKey(0)
    k_params, k_x, k_x2 = jax.random.split(key, 3)

    params = init_params(k_params)

    # Primary small test: batch=8, features=5 (single tile, grid of 1).
    x = jax.random.normal(k_x, (8, IN_F), dtype=jnp.float32)
    out = jax.block_until_ready(neural_network_forward(x, params))
    ref = reference_forward(x, params)
    assert out.shape == (8, OUT_F), out.shape
    assert jnp.allclose(out, ref, atol=1e-5, rtol=1e-5), "f32 mismatch vs JAX reference"

    # Exercise the batch grid + edge padding (B=300 not a multiple of tile 128).
    x2 = jax.random.normal(k_x2, (300, IN_F), dtype=jnp.float32)
    out2 = jax.block_until_ready(neural_network_forward(x2, params, tile_b=128))
    ref2 = reference_forward(x2, params)
    assert out2.shape == (300, OUT_F), out2.shape
    assert jnp.allclose(out2, ref2, atol=1e-5, rtol=1e-5), "tiled f32 mismatch"

    # bf16 streaming path (bf16 x / weights, f32 accumulation inside the kernel).
    out_bf16 = jax.block_until_ready(
        neural_network_forward(x2, params, tile_b=128, param_dtype=jnp.bfloat16)
    )
    ref_bf16 = reference_forward(x2, params, param_dtype=jnp.bfloat16)
    assert out_bf16.shape == (300, OUT_F), out_bf16.shape
    assert jnp.allclose(out_bf16, ref_bf16, atol=1e-3, rtol=1e-3), "bf16 mismatch"

    print("KERNEL_OK")
</pallas_src>

<mosaic_0001>
module attributes {stable_mosaic.version = 11 : i64} {
  func.func @mlp_kernel(%arg0: i32, %arg1: memref<8x5xf32, #tpu.memory_space<vmem>>, %arg2: memref<5x128xf32, #tpu.memory_space<vmem>>, %arg3: memref<3x128x128xf32, #tpu.memory_space<vmem>>, %arg4: memref<4x1x128xf32, #tpu.memory_space<vmem>>, %arg5: memref<8x128xf32, #tpu.memory_space<vmem>>) attributes {dimension_semantics = [#tpu.dimension_semantics<parallel>], iteration_bounds = array<i64: 1>, scalar_prefetch = 0 : i64, scratch_operands = 0 : i64, tpu.core_type = #tpu.core_type<tc>, window_params = [{transform_indices = @transform_0, window_bounds = array<i64: 8, 5>}, {pipeline_mode = #tpu.pipeline_mode<synchronous>, transform_indices = @transform_1, window_bounds = array<i64: 5, 128>}, {pipeline_mode = #tpu.pipeline_mode<synchronous>, transform_indices = @transform_2, window_bounds = array<i64: 3, 128, 128>}, {pipeline_mode = #tpu.pipeline_mode<synchronous>, transform_indices = @transform_3, window_bounds = array<i64: 4, 1, 128>}, {transform_indices = @transform_4, window_bounds = array<i64: 8, 128>}]} {
    %c0 = arith.constant 0 : index
    %c0_0 = arith.constant 0 : index
    %0 = vector.load %arg1[%c0, %c0_0] : memref<8x5xf32, #tpu.memory_space<vmem>>, vector<8x5xf32>
    %c0_1 = arith.constant 0 : index
    %c0_2 = arith.constant 0 : index
    %1 = vector.load %arg2[%c0_1, %c0_2] : memref<5x128xf32, #tpu.memory_space<vmem>>, vector<5x128xf32>
    %cst = arith.constant dense<0.000000e+00> : vector<8x128xf32>
    %2 = tpu.matmul %0, %1, %cst {dimension_numbers = #tpu.dot_dimension_numbers<[1], [0], [0], [1], [0, 0, 1, 1], [], []>} : vector<8x5xf32>, vector<5x128xf32>, vector<8x128xf32> -> vector<8x128xf32>
    %c0_3 = arith.constant 0 : index
    %c0_4 = arith.constant 0 : index
    %c0_5 = arith.constant 0 : index
    %3 = vector.load %arg4[%c0_3, %c0_4, %c0_5] : memref<4x1x128xf32, #tpu.memory_space<vmem>>, vector<1x1x128xf32>
    %4 = vector.shape_cast %3 : vector<1x1x128xf32> to vector<1x128xf32>
    %5 = vector.broadcast %4 : vector<1x128xf32> to vector<8x128xf32>
    %6 = arith.addf %2, %5 : vector<8x128xf32>
    %cst_6 = arith.constant 0.000000e+00 : f32
    %7 = vector.broadcast %cst_6 : f32 to vector<8x128xf32>
    %8 = arith.maximumf %6, %7 : vector<8x128xf32>
    %c0_7 = arith.constant 0 : index
    %c0_8 = arith.constant 0 : index
    %c0_9 = arith.constant 0 : index
    %9 = vector.load %arg3[%c0_7, %c0_8, %c0_9] : memref<3x128x128xf32, #tpu.memory_space<vmem>>, vector<1x128x128xf32>
    %10 = vector.shape_cast %9 : vector<1x128x128xf32> to vector<128x128xf32>
    %cst_10 = arith.constant dense<0.000000e+00> : vector<8x128xf32>
    %11 = tpu.matmul %8, %10, %cst_10 {dimension_numbers = #tpu.dot_dimension_numbers<[1], [0], [0], [1], [0, 0, 1, 1], [], []>} : vector<8x128xf32>, vector<128x128xf32>, vector<8x128xf32> -> vector<8x128xf32>
    %c1 = arith.constant 1 : index
    %c0_11 = arith.constant 0 : index
    %c0_12 = arith.constant 0 : index
    %12 = vector.load %arg4[%c1, %c0_11, %c0_12] : memref<4x1x128xf32, #tpu.memory_space<vmem>>, vector<1x1x128xf32>
    %13 = vector.shape_cast %12 : vector<1x1x128xf32> to vector<1x128xf32>
    %14 = vector.broadcast %13 : vector<1x128xf32> to vector<8x128xf32>
    %15 = arith.addf %11, %14 : vector<8x128xf32>
    %cst_13 = arith.constant 0.000000e+00 : f32
    %16 = vector.broadcast %cst_13 : f32 to vector<8x128xf32>
    %17 = arith.maximumf %15, %16 : vector<8x128xf32>
    %c1_14 = arith.constant 1 : index
    %c0_15 = arith.constant 0 : index
    %c0_16 = arith.constant 0 : index
    %18 = vector.load %arg3[%c1_14, %c0_15, %c0_16] : memref<3x128x128xf32, #tpu.memory_space<vmem>>, vector<1x128x128xf32>
    %19 = vector.shape_cast %18 : vector<1x128x128xf32> to vector<128x128xf32>
    %cst_17 = arith.constant dense<0.000000e+00> : vector<8x128xf32>
    %20 = tpu.matmul %17, %19, %cst_17 {dimension_numbers = #tpu.dot_dimension_numbers<[1], [0], [0], [1], [0, 0, 1, 1], [], []>} : vector<8x128xf32>, vector<128x128xf32>, vector<8x128xf32> -> vector<8x128xf32>
    %c2 = arith.constant 2 : index
    %c0_18 = arith.constant 0 : index
    %c0_19 = arith.constant 0 : index
    %21 = vector.load %arg4[%c2, %c0_18, %c0_19] : memref<4x1x128xf32, #tpu.memory_space<vmem>>, vector<1x1x128xf32>
    %22 = vector.shape_cast %21 : vector<1x1x128xf32> to vector<1x128xf32>
    %23 = vector.broadcast %22 : vector<1x128xf32> to vector<8x128xf32>
    %24 = arith.addf %20, %23 : vector<8x128xf32>
    %cst_20 = arith.constant 0.000000e+00 : f32
    %25 = vector.broadcast %cst_20 : f32 to vector<8x128xf32>
    %26 = arith.maximumf %24, %25 : vector<8x128xf32>
    %c2_21 = arith.constant 2 : index
    %c0_22 = arith.constant 0 : index
    %c0_23 = arith.constant 0 : index
    %27 = vector.load %arg3[%c2_21, %c0_22, %c0_23] : memref<3x128x128xf32, #tpu.memory_space<vmem>>, vector<1x128x128xf32>
    %28 = vector.shape_cast %27 : vector<1x128x128xf32> to vector<128x128xf32>
    %cst_24 = arith.constant dense<0.000000e+00> : vector<8x128xf32>
    %29 = tpu.matmul %26, %28, %cst_24 {dimension_numbers = #tpu.dot_dimension_numbers<[1], [0], [0], [1], [0, 0, 1, 1], [], []>} : vector<8x128xf32>, vector<128x128xf32>, vector<8x128xf32> -> vector<8x128xf32>
    %c3 = arith.constant 3 : index
    %c0_25 = arith.constant 0 : index
    %c0_26 = arith.constant 0 : index
    %30 = vector.load %arg4[%c3, %c0_25, %c0_26] : memref<4x1x128xf32, #tpu.memory_space<vmem>>, vector<1x1x128xf32>
    %31 = vector.shape_cast %30 : vector<1x1x128xf32> to vector<1x128xf32>
    %32 = vector.broadcast %31 : vector<1x128xf32> to vector<8x128xf32>
    %33 = arith.addf %29, %32 : vector<8x128xf32>
    %c0_27 = arith.constant 0 : index
    %c0_28 = arith.constant 0 : index
    %34 = vector.load %arg5[%c0_27, %c0_28] : memref<8x128xf32, #tpu.memory_space<vmem>>, vector<8x128xf32>
    tpu.vector_store %arg5[%c0_27, %c0_28], %33 {strides = array<i32>} : memref<8x128xf32, #tpu.memory_space<vmem>>, vector<8x128xf32>,
    return
  }
  func.func @transform_0(%arg0: i32) -> (i32, i32) {
    %c0_i32 = arith.constant 0 : i32
    %c0_i32_0 = arith.constant 0 : i32
    return %arg0, %c0_i32 : i32, i32
  }
  func.func @transform_1(%arg0: i32) -> (i32, i32) {
    %c0_i32 = arith.constant 0 : i32
    %c0_i32_0 = arith.constant 0 : i32
    %c0_i32_1 = arith.constant 0 : i32
    return %c0_i32, %c0_i32_0 : i32, i32
  }
  func.func @transform_2(%arg0: i32) -> (i32, i32, i32) {
    %c0_i32 = arith.constant 0 : i32
    %c0_i32_0 = arith.constant 0 : i32
    %c0_i32_1 = arith.constant 0 : i32
    %c0_i32_2 = arith.constant 0 : i32
    return %c0_i32, %c0_i32_0, %c0_i32_1 : i32, i32, i32
  }
  func.func @transform_3(%arg0: i32) -> (i32, i32, i32) {
    %c0_i32 = arith.constant 0 : i32
    %c0_i32_0 = arith.constant 0 : i32
    %c0_i32_1 = arith.constant 0 : i32
    %c0_i32_2 = arith.constant 0 : i32
    return %c0_i32, %c0_i32_0, %c0_i32_1 : i32, i32, i32
  }
  func.func @transform_4(%arg0: i32) -> (i32, i32) {
    %c0_i32 = arith.constant 0 : i32
    %c0_i32_0 = arith.constant 0 : i32
    return %arg0, %c0_i32 : i32, i32
  }
}

</mosaic_0001>

<bundles_post_ra>
// kernel: tpu_custom_call.1
= control target key start
LH: loop header
LB: loop body
LE: loop exit
PB: predicated region body
PF: predicated region fallthrough
CT: control target
= control target key end

     0   :  { %9 = vsyncpa [#allocation3], 0  ;;  %s920_s0 = inlined_call_operand.hbm [shape: f32[8,5], index: 0, kind: input, shape index: {}]   ;;  %s921_s1 = inlined_call_operand.hbm [shape: f32[5,128], index: 1, kind: input, shape index: {}]   ;;  %s922_s2 = inlined_call_operand.hbm [shape: f32[3,128,128], index: 2, kind: input, shape index: {}]   ;;  %s923_s3 = inlined_call_operand.vmem [shape: f32[4,1,128], index: 3, kind: input, shape index: {}]   ;;  %s924_s4 = inlined_call_operand.hbm [shape: f32[8,128], index: 4, kind: output, shape index: {}]  }
   0x1   :  { %10 = vsyncpa [#allocation6], 0 }
   0x2   :  { %11 = vsyncpa [#allocation4], 0  ;;  %s793_s15 = smov [#allocation5]   ;;  %s794_s17 = smov [#allocation2]  }
   0x3   :  { %s28_s16 = sshll.u32 %s793_s15, 4  ;;  %s18_s18 = sshll.u32 %s794_s17, 4  ;;  %s29_s16 = int_to_ptr.vmem [resolvable:$true] %s28_s16  ;;  %s19_s18 = int_to_ptr.vmem [resolvable:$true] %s18_s18 }
   0x4   :  { %s699_s21 = scalar_lea.hbm %s921_s1, 128 }
   0x5   :  { %p700_p0 = scmp.ne.s32.totalorder %s921_s1, %s699_s21  ;;  %p703_p1 = scmp.lt.u32.totalorder %s699_s21, %s921_s1 }
   0x7   :  { %p705_p2 = pnand %p703_p1, %p700_p0 }
   0x9   :  { %708 = shalt.err (!%p705_p2)
}
   0xa   :  { %s709_s26 = scalar_lea.vmem %s29_s16, 128  ;;  %p714_p4 = scmp.lt.s32.totalorder %s29_s16, %s29_s16 }
   0xb   :  { %p710_p3 = scmp.ne.s32.totalorder %s29_s16, %s709_s26  ;;  %p715_p5 = scmp.lt.s32.totalorder %s709_s26, %s709_s26 }
   0xd   :  { %p716_p6 = por %p715_p5, %p714_p4 }
   0xf   :  { %p717_p7 = pnand %p716_p6, %p710_p3 }
  0x11   :  { %720 = shalt.err (!%p717_p7)
}
  0x12   :  { %31 = dma.hbm_to_vmem [thread:$0]  %s921_s1, 128, %s29_s16, [#allocation6]  }
  0x13   :  { %s721_s5 = scalar_lea.hbm %s920_s0, 128 }
  0x14   :  { %p722_p8 = scmp.ne.s32.totalorder %s920_s0, %s721_s5  ;;  %p725_p9 = scmp.lt.u32.totalorder %s721_s5, %s920_s0 }
  0x16   :  { %p727_p10 = pnand %p725_p9, %p722_p8 }
  0x18   :  { %730 = shalt.err (!%p727_p10)
}
  0x19   :  { %s731_s10 = scalar_lea.vmem %s19_s18, 128  ;;  %p736_p12 = scmp.lt.s32.totalorder %s19_s18, %s19_s18 }
  0x1a   :  { %p732_p11 = scmp.ne.s32.totalorder %s19_s18, %s731_s10  ;;  %p737_p13 = scmp.lt.s32.totalorder %s731_s10, %s731_s10 }
  0x1c   :  { %p738_p0 = por %p737_p13, %p736_p12 }
  0x1e   :  { %p739_p1 = pnand %p738_p0, %p732_p11 }
  0x20   :  { %742 = shalt.err (!%p739_p1)
}
  0x21   :  { %21 = dma.hbm_to_vmem [thread:$0]  %s920_s0, 128, %s19_s18, [#allocation3]  }
  0x22   :  { %s795_s12 = smov [#allocation7]   ;;  %s743_s16 = scalar_lea.hbm %s922_s2, 6144 }
  0x23   :  { %s37_s13 = sshll.u32 %s795_s12, 4  ;;  %p744_p2 = scmp.ne.s32.totalorder %s922_s2, %s743_s16  ;;  %s38_s13 = int_to_ptr.vmem [resolvable:$true] %s37_s13 }
  0x24   :  { %p747_p3 = scmp.lt.u32.totalorder %s743_s16, %s922_s2 }
  0x26   :  { %p749_p4 = pnand %p747_p3, %p744_p2 }
  0x28   :  { %752 = shalt.err (!%p749_p4)
}
  0x29   :  { %s753_s22 = scalar_lea.vmem %s38_s13, 6144  ;;  %p758_p6 = scmp.lt.s32.totalorder %s38_s13, %s38_s13 }
  0x2a   :  { %p754_p5 = scmp.ne.s32.totalorder %s38_s13, %s753_s22  ;;  %p759_p7 = scmp.lt.s32.totalorder %s753_s22, %s753_s22 }
  0x2c   :  { %p760_p8 = por %p759_p7, %p758_p6 }
  0x2e   :  { %p761_p9 = pnand %p760_p8, %p754_p5 }
  0x30   :  { %764 = shalt.err (!%p761_p9)
}
  0x31   :  { %s796_s0 = smov 128   ;;  %s797_s18 = smov 8  }
  0x32   :  { %43 = dma.hbm_to_vmem [thread:$0]  %s922_s2, 6144, %s38_s13, [#allocation6], %s796_s0, %s796_s0, %s797_s18  }
  0x33   :  { %787 = dma.done.wait [#allocation3], 128  }
  0x34   :  { %788 = vsyncadd [#allocation3], 4294967168 }
  0x35   :  { %789 = dma.done.wait [#allocation6], 6272  }
  0x36   :  { %790 = vsyncadd [#allocation6], 4294961024  ;;  %v798_v0 = vmov 0.0   ;;  %vm799_vm0 = vmmov 0   ;;  %v800_v1 = vmov 0.0|0.0   ;;  %vm68_vm1 = vcmask 1044480  }
  0x37   :  { %508 = vmatprep.subr.mxu0 %v798_v0  ;;  %510 = vmatprep.mubr.msk.f32.mxu0 %vm799_vm0, %v798_v0  ;;  %vm64_vm2 = vcmask 39936   ;;  %v56_v2 = vld [vmem:[#allocation5] sm:$0x1f]  ;;  %v55_v3 = vld [vmem:[#allocation2] sm:$0xff]  ;;  %v143_v4 = vld [vmem:[#allocation7] sm:$0xff]  ;;  %s801_s6 = smov [#allocation8]  }
  0x38   :  { %618 = vmatprep.subr.bf16.mxu1 %v800_v1  ;;  %545 = vmatprep.mubr.msk.f32.mxu1 %vm799_vm0, %v798_v0  ;;  %v144_v5 = vld [vmem:[#allocation7 + $0x8] sm:$0xff]  ;;  %v145_v6 = vld [vmem:[#allocation7 + $0x10] sm:$0xff]  ;;  %v146_v7 = vld [vmem:[#allocation7 + $0x18] sm:$0xff]  ;;  %s436_s7 = sshll.u32 %s801_s6, 4  ;;  %s437_s7 = int_to_ptr.vmem [resolvable:$true] %s436_s7 }
  0x39   :  { %509 = vmatpush3.msk.msra.mxu0 %vm68_vm1, %v56_v2  ;;  %v619_v8 = vpack.c.bf16 %v144_v5, %v143_v4  ;;  %v622_v9 = vpack.c.bf16 %v146_v7, %v145_v6  ;;  %v147_v10 = vld [vmem:[#allocation7 + $0x20] sm:$0xff]  ;;  %v148_v11 = vld [vmem:[#allocation7 + $0x28] sm:$0xff]  ;;  %v149_v13 = vld [vmem:[#allocation7 + $0x30] sm:$0xff]  ;;  %s765_s8 = scalar_lea.vmem %s437_s7, 128  ;;  %p770_p11 = scmp.lt.s32.totalorder %s437_s7, %s437_s7 }
  0x3a   :  { %511 = vmatmul.mubr.msk.f32.vlgmr.msra.gmra.mrb[0].mxu0 %vm64_vm2, %v55_v3  ;;  %642 = vmatprep.subr.bf16.mxu0 %v800_v1  ;;  %v625_v12 = vpack.c.bf16 %v148_v11, %v147_v10  ;;  %v150_v14 = vld [vmem:[#allocation7 + $0x38] sm:$0xff]  ;;  %v151_v16 = vld [vmem:[#allocation7 + $0x40] sm:$0xff]  ;;  %v152_v17 = vld [vmem:[#allocation7 + $0x48] sm:$0xff]  ;;  %p766_p10 = scmp.ne.s32.totalorder %s437_s7, %s765_s8  ;;  %p771_p12 = scmp.lt.s32.totalorder %s765_s8, %s765_s8 }
  0x3b   :  { %580 = vmatprep.mubr.msk.f32.mxu0 %vm799_vm0, %v798_v0  ;;  %620 = vmatpush3.bf16.msra.mxu1 %v619_v8  ;;  %v628_v15 = vpack.c.bf16 %v150_v14, %v149_v13  ;;  %v631_v18 = vpack.c.bf16 %v152_v17, %v151_v16  ;;  %v153_v19 = vld [vmem:[#allocation7 + $0x50] sm:$0xff]  ;;  %v154_v20 = vld [vmem:[#allocation7 + $0x58] sm:$0xff]  ;;  %v155_v22 = vld [vmem:[#allocation7 + $0x60] sm:$0xff] }
  0x3c   :  { %621 = vmatprep.subr.bf16.mxu1 %v800_v1  ;;  %v634_v21 = vpack.c.bf16 %v154_v20, %v153_v19  ;;  %v156_v23 = vld [vmem:[#allocation7 + $0x68] sm:$0xff]  ;;  %v157_v25 = vld [vmem:[#allocation7 + $0x70] sm:$0xff]  ;;  %v158_v26 = vld [vmem:[#allocation7 + $0x78] sm:$0xff]  ;;  %p772_p13 = por %p771_p12, %p770_p11 }
  0x3d   :  { %v637_v24 = vpack.c.bf16 %v156_v23, %v155_v22  ;;  %v640_v27 = vpack.c.bf16 %v158_v26, %v157_v25  ;;  %v239_v28 = vld [vmem:[#allocation7 + $0x80] sm:$0xff]  ;;  %v240_v29 = vld [vmem:[#allocation7 + $0x88] sm:$0xff]  ;;  %v241_v30 = vld [vmem:[#allocation7 + $0x90] sm:$0xff] }
  0x3e   :  { %v643_v31 = vpack.c.bf16 %v240_v29, %v239_v28  ;;  %v242_v32 = vld [vmem:[#allocation7 + $0x98] sm:$0xff]  ;;  %v243_v34 = vld [vmem:[#allocation7 + $0xa0] sm:$0xff]  ;;  %v244_v35 = vld [vmem:[#allocation7 + $0xa8] sm:$0xff]  ;;  %p773_p0 = pnand %p772_p13, %p766_p10 }
  0x3f   :  { %623 = vmatpush3.bf16.msra.mxu1 %v622_v9  ;;  %v646_v33 = vpack.c.bf16 %v242_v32, %v241_v30  ;;  %v649_v36 = vpack.c.bf16 %v244_v35, %v243_v34  ;;  %v245_v37 = vld [vmem:[#allocation7 + $0xb0] sm:$0xff]  ;;  %v246_v38 = vld [vmem:[#allocation7 + $0xb8] sm:$0xff]  ;;  %v247_v40 = vld [vmem:[#allocation7 + $0xc0] sm:$0xff] }
  0x40   :  { %624 = vmatprep.subr.bf16.mxu1 %v800_v1  ;;  %644 = vmatpush3.bf16.msra.mxu0 %v643_v31  ;;  %v652_v39 = vpack.c.bf16 %v246_v38, %v245_v37  ;;  %v248_v41 = vld [vmem:[#allocation7 + $0xc8] sm:$0xff]  ;;  %v249_v43 = vld [vmem:[#allocation7 + $0xd0] sm:$0xff]  ;;  %v250_v44 = vld [vmem:[#allocation7 + $0xd8] sm:$0xff] }
  0x41   :  { %645 = vmatprep.subr.bf16.mxu0 %v800_v1  ;;  %v655_v42 = vpack.c.bf16 %v248_v41, %v247_v40  ;;  %v658_v45 = vpack.c.bf16 %v250_v44, %v249_v43  ;;  %v251_v46 = vld [vmem:[#allocation7 + $0xe0] sm:$0xff]  ;;  %v252_v47 = vld [vmem:[#allocation7 + $0xe8] sm:$0xff]  ;;  %v446_v49 = vld [vmem:[%s923_s3] ss:$0 sm:$0xff] }
  0x42   :  { %v661_v48 = vpack.c.bf16 %v252_v47, %v251_v46  ;;  %v253_v54 = vld [vmem:[#allocation7 + $0xf0] sm:$0xff]  ;;  %v254_v55 = vld [vmem:[#allocation7 + $0xf8] sm:$0xff]  ;;  %v335_v57 = vld [vmem:[#allocation7 + $0x100] sm:$0xff] }
  0x43   :  { %626 = vmatpush3.bf16.msra.mxu1 %v625_v12  ;;  %v664_v56 = vpack.c.bf16 %v254_v55, %v253_v54  ;;  %v336_v58 = vld [vmem:[#allocation7 + $0x108] sm:$0xff]  ;;  %v337_v59 = vld [vmem:[#allocation7 + $0x110] sm:$0xff]  ;;  %v338_v61 = vld [vmem:[#allocation7 + $0x118] sm:$0xff] }
  0x44   :  { %627 = vmatprep.subr.bf16.mxu1 %v800_v1  ;;  %647 = vmatpush3.bf16.msra.mxu0 %v646_v33  ;;  %v667_v60 = vpack.c.bf16 %v336_v58, %v335_v57  ;;  %v670_v62 = vpack.c.bf16 %v338_v61, %v337_v59  ;;  %v339_v63 = vld [vmem:[#allocation7 + $0x120] sm:$0xff]  ;;  %v340_v2 = vld [vmem:[#allocation7 + $0x128] sm:$0xff]  ;;  %v342_v4 = vld [vmem:[#allocation7 + $0x138] sm:$0xff] }
  0x45   :  { %648 = vmatprep.subr.bf16.mxu0 %v800_v1  ;;  %v673_v3 = vpack.c.bf16 %v340_v2, %v339_v63  ;;  %v343_v6 = vld [vmem:[#allocation7 + $0x140] sm:$0xff]  ;;  %v344_v7 = vld [vmem:[#allocation7 + $0x148] sm:$0xff]  ;;  %v345_v9 = vld [vmem:[#allocation7 + $0x150] sm:$0xff] }
  0x46   :  { %v679_v8 = vpack.c.bf16 %v344_v7, %v343_v6  ;;  %v346_v10 = vld [vmem:[#allocation7 + $0x158] sm:$0xff]  ;;  %v347_v12 = vld [vmem:[#allocation7 + $0x160] sm:$0xff]  ;;  %v348_v13 = vld [vmem:[#allocation7 + $0x168] sm:$0xff] }
  0x47   :  { %629 = vmatpush3.bf16.msra.mxu1 %v628_v15  ;;  %v682_v11 = vpack.c.bf16 %v346_v10, %v345_v9  ;;  %v685_v14 = vpack.c.bf16 %v348_v13, %v347_v12  ;;  %v450_v15 = vld [vmem:[%s923_s3 + $0x1] ss:$0 sm:$0xff]  ;;  %v452_v23 = vld [vmem:[%s923_s3 + $0x2] ss:$0 sm:$0xff] }
  0x48   :  { %630 = vmatprep.subr.bf16.mxu1 %v800_v1  ;;  %650 = vmatpush3.bf16.msra.mxu0 %v649_v36  ;;  %v349_v20 = vld [vmem:[#allocation7 + $0x170] sm:$0xff] }
  0x49   :  { %651 = vmatprep.subr.bf16.mxu0 %v800_v1 }
  0x4b   :  { %632 = vmatpush3.bf16.msra.mxu1 %v631_v18 }
  0x4c   :  { %633 = vmatprep.subr.bf16.mxu1 %v800_v1  ;;  %653 = vmatpush3.bf16.msra.mxu0 %v652_v39 }
  0x4d   :  { %654 = vmatprep.subr.bf16.mxu0 %v800_v1 }
  0x4f   :  { %635 = vmatpush3.bf16.msra.mxu1 %v634_v21  ;;  %v350_v21 = vld [vmem:[#allocation7 + $0x178] sm:$0xff] }
  0x50   :  { %636 = vmatprep.subr.bf16.mxu1 %v800_v1  ;;  %656 = vmatpush3.bf16.msra.mxu0 %v655_v42  ;;  %v688_v22 = vpack.c.bf16 %v350_v21, %v349_v20 }
  0x51   :  { %657 = vmatprep.subr.bf16.mxu0 %v800_v1 }
  0x53   :  { %638 = vmatpush3.bf16.msra.mxu1 %v637_v24 }
  0x54   :  { %639 = vmatprep.subr.bf16.mxu1 %v800_v1  ;;  %659 = vmatpush3.bf16.msra.mxu0 %v658_v45 }
  0x55   :  { %660 = vmatprep.subr.bf16.mxu0 %v800_v1 }
  0x57   :  { %641 = vmatpush3.bf16.msra.mxu1 %v640_v27  ;;  %v454_v27 = vld [vmem:[%s923_s3 + $0x3] ss:$0 sm:$0xff] }
  0x58   :  { %666 = vmatprep.subr.bf16.mxu1 %v800_v1  ;;  %662 = vmatpush3.bf16.msra.mxu0 %v661_v48 }
  0x59   :  { %663 = vmatprep.subr.bf16.mxu0 %v800_v1 }
  0x5c   :  { %665 = vmatpush3.bf16.msra.mxu0 %v664_v56 }
 0x10d   :  { %v138_v50 = vpop.f32.mrb[0].mxu0 }
 0x10e   :  { %v139_v51 = vadd.f32 %v446_v49, %v138_v50  ;;  %v512_v52 = vpop.f32.mrb[1].mxu0 }
 0x110   :  { %v142_v53 = vmax.f32 %v139_v51, 0.0 }
 0x112   :  { %546 = vmatmul.mubr.f32.vlgmr.msra.gmra.mrb[0].mxu1 %v142_v53 }
 0x113   :  { %615 = vmatprep.mubr.msk.f32.mxu1 %vm799_vm0, %v798_v0  ;;  %668 = vmatpush3.bf16.msra.mxu1 %v667_v60  ;;  %v341_v0 = vld [vmem:[#allocation7 + $0x130] sm:$0xff] }
 0x114   :  { %669 = vmatprep.subr.bf16.mxu1 %v800_v1  ;;  %v676_v5 = vpack.c.bf16 %v342_v4, %v341_v0 }
 0x117   :  { %671 = vmatpush3.bf16.msra.mxu1 %v670_v62 }
 0x118   :  { %672 = vmatprep.subr.bf16.mxu1 %v800_v1 }
 0x11b   :  { %674 = vmatpush3.bf16.msra.mxu1 %v673_v3 }
 0x11c   :  { %675 = vmatprep.subr.bf16.mxu1 %v800_v1 }
 0x11f   :  { %677 = vmatpush3.bf16.msra.mxu1 %v676_v5 }
 0x120   :  { %678 = vmatprep.subr.bf16.mxu1 %v800_v1 }
 0x123   :  { %680 = vmatpush3.bf16.msra.mxu1 %v679_v8 }
 0x124   :  { %681 = vmatprep.subr.bf16.mxu1 %v800_v1 }
 0x127   :  { %683 = vmatpush3.bf16.msra.mxu1 %v682_v11 }
 0x128   :  { %684 = vmatprep.subr.bf16.mxu1 %v800_v1 }
 0x12b   :  { %686 = vmatpush3.bf16.msra.mxu1 %v685_v14 }
 0x12c   :  { %687 = vmatprep.subr.bf16.mxu1 %v800_v1 }
 0x12f   :  { %689 = vmatpush3.bf16.msra.mxu1 %v688_v22 }
 0x1e5   :  { %v233_v16 = vpop.f32.mrb[0].mxu1 }
 0x1e6   :  { %v234_v17 = vadd.f32 %v450_v15, %v233_v16  ;;  %v547_v18 = vpop.f32.mrb[1].mxu1 }
 0x1e8   :  { %v237_v19 = vmax.f32 %v234_v17, 0.0 }
 0x1ea   :  { %581 = vmatmul.mubr.f32.vlgmr.msra.gmra.mrb[2].mxu0 %v237_v19 }
 0x2bd   :  { %v329_v24 = vpop.f32.mrb[2].mxu0 }
 0x2be   :  { %v330_v25 = vadd.f32 %v452_v23, %v329_v24  ;;  %v582_v1 = vpop.f32.mrb[3].mxu0 }
 0x2c0   :  { %v333_v26 = vmax.f32 %v330_v25, 0.0 }
 0x2c2   :  { %616 = vmatmul.mubr.f32.vlgmr.msra.gmra.mrb[2].mxu1 %v333_v26 }
 0x395   :  { %v425_v28 = vpop.f32.mrb[2].mxu1 }
 0x396   :  { %v426_v29 = vadd.f32 %v454_v27, %v425_v28  ;;  %v617_v30 = vpop.f32.mrb[3].mxu1 }
 0x398   :  { %429 = vst [vmem:[#allocation8] sm:$0xff] %v426_v29 }
 0x399   :  { %776 = shalt.err (!%p773_p0)
}
 0x39a   :  { %s777_s1 = scalar_lea.hbm %s924_s4, 128 }
 0x39b   :  { %p778_p1 = scmp.ne.s32.totalorder %s924_s4, %s777_s1  ;;  %p781_p2 = scmp.lt.u32.totalorder %s777_s1, %s924_s4 }
 0x39d   :  { %p783_p3 = pnand %p781_p2, %p778_p1 }
 0x39f   :  { %786 = shalt.err (!%p783_p3)
}
 0x3a0   :  { %439 = dma.vmem_to_hbm [thread:$0]  %s437_s7, 128, %s924_s4, [#allocation4]  }
 0x3a1   :  { %791 = dma.done.wait [#allocation4], 128  }
 0x3a2   :  { %792 = vsyncadd [#allocation4], 4294967168 }
 0x3a3   :  { %443 = vsyncpa [#allocation3], 1 }
 0x3a4   :  { %444 = vsyncpa [#allocation6], 1 }
 0x3a5   :  { %445 = vsyncpa [#allocation4], 1 }

</bundles_post_ra>
